<compile_context>
chip_gen: v7x
topology: tpu7x:2x2x1
jax: 0.10.0
libtpu: 0.0.40
codegen_flags: <defaults>
</compile_context>

<pallas_src>
import functools

import jax
import jax.numpy as jnp
import numpy as np
from jax.experimental import pallas as pl
from jax.experimental.pallas import tpu as pltpu


# ---------------------------------------------------------------------------
# Kernel
# ---------------------------------------------------------------------------

def _layer_chunk(x, l, feat, method, lane_aligned):
    """Layer-l chunk of the re-uploaded tile: x rolled right by l (cyclic) or x."""
    shift = (l % feat) if method == "cyclic" else 0
    if shift == 0:
        return x
    if lane_aligned:
        # out[:, j] = x[:, (j - shift) % feat]  == np.roll/torch.roll(x, shift, dim=1)
        return pltpu.roll(x, shift=shift, axis=1)
    return jnp.concatenate([x[:, feat - shift:], x[:, :feat - shift]], axis=1)


def _reupload_kernel(*refs, num_layers, feat, method, skolik, weighted, lane_aligned):
    if weighted:
        x_ref, w_ref, o_ref = refs
    else:
        (x_ref, o_ref), w_ref = refs, None

    x = x_ref[...]
    if skolik:
        # skolik preprocessing is elementwise, so it commutes with the tiling /
        # rotation: apply it once to the (TB, F) input block.
        x = (x + 1.0) * 0.5

    if lane_aligned:
        # F % 128 == 0: one unmasked, lane-aligned slice store per layer chunk,
        # no (TB, num_layers*F) concat temp.  Rotation for the cyclic method
        # rides the XLU, off the store-bound critical path.
        for l in range(num_layers):
            c = _layer_chunk(x, l, feat, method, True)
            if weighted:
                c = c * w_ref[:, l * feat:(l + 1) * feat]
            o_ref[:, l * feat:(l + 1) * feat] = c.astype(o_ref.dtype)
    else:
        # Small / unaligned feature dims (e.g. F=4 -> OUT=16): the whole output
        # row is sub-lane-width anyway, so build the tile and do a single store.
        # TODO(synk): for huge B with OUT < 128 a lane-dense repacking (fold g
        # batch rows into lanes) would improve burst efficiency further.
        t = jnp.concatenate(
            [_layer_chunk(x, l, feat, method, False) for l in range(num_layers)],
            axis=1)
        if weighted:
            t = t * w_ref[...]
        o_ref[...] = t.astype(o_ref.dtype)


# ---------------------------------------------------------------------------
# Tiling / VMEM heuristics
# ---------------------------------------------------------------------------

def _vmem_budget_and_cap():
    """(per-step block budget, physical VMEM capacity) — generation aware."""
    try:
        cap = int(pltpu.get_tpu_info().vmem_capacity_bytes)
    except Exception:
        cap = 64 << 20                       # conservative fallback (v7x per-TC VMEM)
    kind = ""
    try:
        kind = jax.devices()[0].device_kind.lower()
    except Exception:
        pass
    if ("v5 lite" in kind) or ("v5e" in kind) or ("v5lite" in kind):
        budget = 10 << 20                    # stay inside v5e's 16 MiB scoped default
    else:
        budget = int(min(cap // 4, 24 << 20))  # v6e: 24 MiB of 128; v7x: 16 MiB of 64
    return max(budget, 4 << 20), cap


def _pick_batch_tile(batch, feat, num_layers, itemsize, budget_bytes):
    """Largest sublane-aligned batch tile under budget, with >= 2 grid steps."""
    packing = max(1, 4 // itemsize)          # f32 -> 1, bf16 -> 2, int8 -> 4
    sub = 8 * packing                        # sublane multiple for this dtype
    if batch <= sub:
        return batch                         # full-extent block is always legal
    per_row = 2 * feat * (1 + num_layers) * itemsize   # double-buffered in + out
    tile = budget_bytes // max(per_row, 1)
    tile = min(tile, 4096)
    tile = max(sub, (tile // sub) * sub)
    # Guarantee >= 2 grid steps so dimension_semantics=("parallel",) can shard
    # the grid across v7x's two TensorCores (and load-balance them).
    half = ((pl.cdiv(batch, 2) + sub - 1) // sub) * sub
    tile = max(sub, min(tile, half))
    if tile >= batch:
        return batch
    return tile


# ---------------------------------------------------------------------------
# Wrapper
# ---------------------------------------------------------------------------

def data_reuploading_forward(x, num_layers=4, method="normal",
                             input_weights=None, skolik=False, input_scale=None):
    """Pallas forward for data_reuploading, optionally fused with the add_weights
    input layer (with optional skolik preprocessing) and the scalar input scale."""
    if method not in ("normal", "cyclic"):
        raise ValueError(f"unknown method: {method}")
    x = jnp.asarray(x)
    squeeze = False
    if x.ndim == 1:
        if method == "cyclic":
            raise ValueError("cyclic re-uploading requires a 2-D (batch, features) input")
        x = x[None, :]
        squeeze = True
    assert x.ndim == 2, "kernel implemented for (batch, features) inputs"

    B, F = x.shape
    OUT = num_layers * F
    itemsize = jnp.dtype(x.dtype).itemsize
    budget, cap = _vmem_budget_and_cap()
    TB = _pick_batch_tile(B, F, num_layers, itemsize, budget)
    grid = (pl.cdiv(B, TB),)
    lane_aligned = (F % 128 == 0)

    # Fold the scalar input-scaling parameter into the weight vector (both are
    # plain elementwise multiplies in the reference module).
    w = None
    if input_weights is not None:
        w = jnp.asarray(input_weights, dtype=x.dtype).reshape(1, OUT)
        if input_scale is not None:
            w = w * jnp.asarray(input_scale, dtype=x.dtype)
    elif input_scale is not None:
        w = jnp.full((1, OUT), input_scale, dtype=x.dtype)

    in_specs = [pl.BlockSpec((TB, F), lambda i: (i, 0))]
    args = [x]
    if w is not None:
        in_specs.append(pl.BlockSpec((1, OUT), lambda i: (0, 0)))   # grid-invariant
        args.append(w)

    kernel = functools.partial(
        _reupload_kernel, num_layers=num_layers, feat=F, method=method,
        skolik=skolik, weighted=(w is not None), lane_aligned=lane_aligned)

    # Double-buffered VMEM footprint of one grid step; raise the scoped limit
    # only when the blocks actually need more than v5e's 16 MiB default allows.
    need = 2 * TB * (F + OUT) * itemsize
    if w is not None:
        need += 2 * OUT * itemsize
    cp_kwargs = dict(dimension_semantics=("parallel",))
    if need > (10 << 20):
        cp_kwargs["vmem_limit_bytes"] = int(
            min(need + need // 2 + (2 << 20), max(cap // 2, 32 << 20)))

    # Pure HBM-bandwidth op — tell XLA so it can overlap it with neighbours.
    flops = 0
    if w is not None:
        flops += B * OUT
    if skolik:
        flops += 2 * B * OUT
    bytes_accessed = (B * F + B * OUT) * itemsize + (OUT * itemsize if w is not None else 0)
    cost = pl.CostEstimate(flops=int(flops), transcendentals=0,
                           bytes_accessed=int(bytes_accessed))

    out = pl.pallas_call(
        kernel,
        out_shape=jax.ShapeDtypeStruct((B, OUT), x.dtype),
        grid=grid,
        in_specs=in_specs,
        out_specs=pl.BlockSpec((TB, OUT), lambda i: (i, 0)),
        compiler_params=pltpu.CompilerParams(**cp_kwargs),
        cost_estimate=cost,
    )(*args)
    return out[0] if squeeze else out


def tianshou_layer_preprocess(obs, *, data_reuploading_layers=4,
                              data_reuploading_type="normal",
                              input_weights=None, input_scale=None):
    """Classical pre-processing half of tianshou_layer.forward: data re-uploading
    + optional add_weights input layer + input scaling, fused into one Pallas
    kernel.  Returns the tensor that feeds the VQC."""
    obs = jnp.asarray(obs)
    num_layers = data_reuploading_layers if data_reuploading_layers != 0 else 1
    method = data_reuploading_type if data_reuploading_layers != 0 else "normal"
    obs = data_reuploading_forward(obs, num_layers=num_layers, method=method,
                                   input_weights=input_weights,
                                   input_scale=input_scale)
    # TODO(synk): HybridFunction.apply(QcN, obs, trainable_parameters, shift) — the
    # variational-quantum-circuit evaluation (qiskit analytical/shot-based/ibmq
    # executors) and the post-VQC output weighting/scaling have no Pallas equivalent.
    return obs


# ---------------------------------------------------------------------------
# Pure-JAX reference + tests
# ---------------------------------------------------------------------------

def _reference(x, num_layers, method, w=None, skolik=False):
    """Pure-JAX reference mirroring the PyTorch forward."""
    if method == "normal":
        y = jnp.tile(x, (1, num_layers))
    else:
        cols = [x]
        xt = x
        for _ in range(1, num_layers):
            xt = jnp.roll(xt, 1, axis=1)
            cols.append(xt)
        y = jnp.concatenate(cols, axis=1)
    if skolik:
        y = (y + 1.0) / 2.0
    if w is not None:
        y = y * w
    return y


if __name__ == "__main__":
    key = jax.random.PRNGKey(0)
    k0, k1, k2, k3 = jax.random.split(key, 4)
    ok = True

    def check(a, b):
        return a.shape == b.shape and np.allclose(np.asarray(a), np.asarray(b),
                                                  rtol=1e-6, atol=1e-6)

    # Small, module-faithful shapes: input_dim=4, 4 data-reuploading layers
    # (unaligned / concat path, grid=(1,)).
    x_small = jax.random.normal(k0, (8, 4), dtype=jnp.float32)
    for method in ("normal", "cyclic"):
        y = jax.block_until_ready(
            data_reuploading_forward(x_small, num_layers=4, method=method))
        ok &= check(y, _reference(x_small, 4, method))

    # Fused add_weights input layer + scalar input scaling + skolik preprocessing.
    w_in = jax.random.uniform(k1, (1, 16), dtype=jnp.float32, minval=0.0, maxval=np.pi)
    y = jax.block_until_ready(
        data_reuploading_forward(x_small, num_layers=4, method="normal",
                                 input_weights=w_in, skolik=True, input_scale=0.5))
    ok &= check(y, _reference(x_small, 4, "normal", w=w_in * 0.5, skolik=True))

    # skolik without weights/scale (previously dropped — now applied).
    y = jax.block_until_ready(
        data_reuploading_forward(x_small, num_layers=4, method="cyclic", skolik=True))
    ok &= check(y, _reference(x_small, 4, "cyclic", skolik=True))

    # Larger, lane-aligned shapes: exercises the tiled batch grid (>=2 steps),
    # the per-layer lane-aligned slice stores and the pltpu.roll (XLU) cyclic path.
    x_big = jax.random.normal(k2, (4096, 128), dtype=jnp.float32)
    for method in ("normal", "cyclic"):
        y = jax.block_until_ready(
            data_reuploading_forward(x_big, num_layers=3, method=method))
        ok &= check(y, _reference(x_big, 3, method))

    # Lane-aligned weighted + skolik path.
    w_big = jax.random.uniform(k3, (1, 256), dtype=jnp.float32, minval=0.0, maxval=np.pi)
    y = jax.block_until_ready(
        data_reuploading_forward(x_big, num_layers=2, method="cyclic",
                                 input_weights=w_big, skolik=True))
    ok &= check(y, _reference(x_big, 2, "cyclic", w=w_big, skolik=True))

    # tianshou_layer classical preprocessing wrapper (same kernel underneath).
    y = jax.block_until_ready(
        tianshou_layer_preprocess(x_small, data_reuploading_layers=4,
                                  data_reuploading_type="cyclic"))
    ok &= check(y, _reference(x_small, 4, "cyclic"))

    print("KERNEL_OK" if ok else "KERNEL_MISMATCH")
</pallas_src>

<mosaic_0001>
module attributes {stable_mosaic.version = 11 : i64} {
  func.func @_reupload_kernel(%arg0: i32, %arg1: memref<8x4xf32, #tpu.memory_space<vmem>>, %arg2: memref<8x16xf32, #tpu.memory_space<vmem>>) attributes {dimension_semantics = [#tpu.dimension_semantics<parallel>], iteration_bounds = array<i64: 1>, scalar_prefetch = 0 : i64, scratch_operands = 0 : i64, tpu.core_type = #tpu.core_type<tc>, window_params = [{transform_indices = @transform_0, window_bounds = array<i64: 8, 4>}, {transform_indices = @transform_1, window_bounds = array<i64: 8, 16>}]} {
    %c0 = arith.constant 0 : index
    %c0_0 = arith.constant 0 : index
    %0 = vector.load %arg1[%c0, %c0_0] : memref<8x4xf32, #tpu.memory_space<vmem>>, vector<8x4xf32>
    %1 = tpu.concatenate %0, %0, %0, %0 in 1 : vector<8x4xf32>, vector<8x4xf32>, vector<8x4xf32>, vector<8x4xf32> -> vector<8x16xf32>
    %c0_1 = arith.constant 0 : index
    %c0_2 = arith.constant 0 : index
    %2 = vector.load %arg2[%c0_1, %c0_2] : memref<8x16xf32, #tpu.memory_space<vmem>>, vector<8x16xf32>
    tpu.vector_store %arg2[%c0_1, %c0_2], %1 {strides = array<i32>} : memref<8x16xf32, #tpu.memory_space<vmem>>, vector<8x16xf32>,
    return
  }
  func.func @transform_0(%arg0: i32) -> (i32, i32) {
    %c0_i32 = arith.constant 0 : i32
    %c0_i32_0 = arith.constant 0 : i32
    return %arg0, %c0_i32 : i32, i32
  }
  func.func @transform_1(%arg0: i32) -> (i32, i32) {
    %c0_i32 = arith.constant 0 : i32
    %c0_i32_0 = arith.constant 0 : i32
    return %arg0, %c0_i32 : i32, i32
  }
}

</mosaic_0001>

<bundles_post_ra>
// kernel: tpu_custom_call.1
= control target key start
LH: loop header
LB: loop body
LE: loop exit
PB: predicated region body
PF: predicated region fallthrough
CT: control target
= control target key end

     0   :  { %s70_s8 = smov 4   ;;  %s99_s0 = inlined_call_operand.vmem [shape: f32[8,4], index: 0, kind: input, shape index: {}]   ;;  %s100_s1 = inlined_call_operand.hbm [shape: f32[8,16], index: 1, kind: output, shape index: {}]  }
   0x1   :  { %v9_v0 = vld [vmem:[%s99_s0] sm:$0xff] }
   0x2   :  { %11 = vrot.lane.b32.xlu0 %v9_v0, %s70_s8 }
   0x3   :  { %6 = vsyncpa [#allocation3], 0  ;;  %s71_s9 = smov 12   ;;  %s72_s10 = smov 8   ;;  %vm20_vm0 = vcmask 31744   ;;  %vm22_vm1 = vcmask 64512  }
   0x4   :  { %17 = vrot.lane.b32.xlu1 %v9_v0, %s71_s9  ;;  %s73_s11 = smov [#allocation2]   ;;  %vm24_vm2 = vcmask 97280   ;;  %vm26_vm3 = vcmask 130048  }
   0x5   :  { %s34_s12 = sshll.u32 %s73_s11, 4  ;;  %s35_s12 = int_to_ptr.vmem [resolvable:$true] %s34_s12 }
   0x6   :  { %14 = vrot.lane.b32.xlu0 %v9_v0, %s72_s10  ;;  %s46_s0 = scalar_lea.vmem %s35_s12, 128  ;;  %p51_p1 = scmp.lt.s32.totalorder %s35_s12, %s35_s12 }
   0x7   :  { %p47_p0 = scmp.ne.s32.totalorder %s35_s12, %s46_s0  ;;  %p52_p2 = scmp.lt.s32.totalorder %s46_s0, %s46_s0 }
   0x9   :  { %p53_p3 = por %p52_p2, %p51_p1 }
   0xb   :  { %p54_p4 = pnand %p53_p3, %p47_p0 }
  0x74   :  { %v12_v1 = vpop.permute.xlu0 %11 }
  0x75   :  { %v21_v3 = vsel %vm20_vm0, %v9_v0, %v12_v1 }
  0x76   :  { %v18_v2 = vpop.permute.xlu1 %17 }
  0x78   :  { %v15_v4 = vpop.permute.xlu0 %14 }
  0x79   :  { %v23_v5 = vsel %vm22_vm1, %v21_v3, %v15_v4 }
  0x7a   :  { %v25_v6 = vsel %vm24_vm2, %v23_v5, %v18_v2 }
  0x7b   :  { %27 = vst.msk [vmem:[#allocation2] sm:$0xff] %vm26_vm3, %v25_v6 }
  0x7c   :  { %57 = shalt.err (!%p54_p4)
}
  0x7d   :  { %s58_s15 = scalar_lea.hbm %s100_s1, 128 }
  0x7e   :  { %p59_p5 = scmp.ne.s32.totalorder %s100_s1, %s58_s15  ;;  %p62_p6 = scmp.lt.u32.totalorder %s58_s15, %s100_s1 }
  0x80   :  { %p64_p7 = pnand %p62_p6, %p59_p5 }
  0x82   :  { %67 = shalt.err (!%p64_p7)
}
  0x83   :  { %37 = dma.vmem_to_hbm [thread:$0]  %s35_s12, 128, %s100_s1, [#allocation3]  }
  0x84   :  { %68 = dma.done.wait [#allocation3], 128  }
  0x85   :  { %69 = vsyncadd [#allocation3], 4294967168 }
  0x86   :  { %41 = vsyncpa [#allocation3], 1 }

</bundles_post_ra>
